<compile_context>
chip_gen: v5e
topology: v5e:2x2
jax: 0.10.0
libtpu: 0.0.40
codegen_flags: <defaults>
</compile_context>

<pallas_src>
import math
import functools

import jax
import jax.numpy as jnp
from jax.experimental import pallas as pl
from jax.experimental.pallas import tpu as pltpu

DROPOUT_P = 0.4


def _attn_dropout_kernel(q_ref, k_ref, v_ref, ds_ref, o_ref, *, scale):
    # q_ref: (TQ, D), k_ref: (SK, D), v_ref: (SK, DV), ds_ref: (TQ, SK)
    q = q_ref[...]
    k = k_ref[...]
    v = v_ref[...]

    # qk = q @ k^T, contraction over the last dim of both operands (no k.T).
    s = jax.lax.dot_general(
        q, k,
        dimension_numbers=(((1,), (1,)), ((), ())),
        preferred_element_type=jnp.float32,
    ) * scale

    # Numerically stable softmax along the last axis.
    m = jnp.max(s, axis=-1, keepdims=True)
    e = jnp.exp(s - m)
    denom = jnp.sum(e, axis=-1, keepdims=True)
    inv_denom = 1.0 / denom  # per-row reciprocal, broadcast over lanes

    # Dropout: ds_ref already holds keep_mask / (1 - p)  -> one multiply/elem.
    dropped = e * (ds_ref[...] * inv_denom)

    # out = dropout_qk @ v
    o_ref[...] = jnp.dot(
        dropped, v, preferred_element_type=jnp.float32
    ).astype(o_ref.dtype)


def attention_with_dropout(q, k, v, drop_scale, *, tq=128):
    """q: (SQ, D), k: (SK, D), v: (SK, DV), drop_scale: (SQ, SK) -> (SQ, DV)."""
    sq, d = q.shape
    sk, dk = k.shape
    skv, dv = v.shape
    assert d == dk and sk == skv
    assert drop_scale.shape == (sq, sk)

    tq = min(tq, sq)
    assert sq % tq == 0, "SQ must be divisible by the query tile size"

    scale = 1.0 / math.sqrt(d)  # logical D (q.size(-1)), matching PyTorch
    kernel = functools.partial(_attn_dropout_kernel, scale=scale)

    flops = 2 * sq * sk * (d + dv)
    bytes_accessed = 4 * (sq * d + sk * d + sk * dv + sq * sk + sq * dv)

    return pl.pallas_call(
        kernel,
        out_shape=jax.ShapeDtypeStruct((sq, dv), jnp.float32),
        grid=(sq // tq,),
        in_specs=[
            pl.BlockSpec((tq, d), lambda i: (i, 0)),   # q tile
            pl.BlockSpec((sk, d), lambda i: (0, 0)),   # k (resident)
            pl.BlockSpec((sk, dv), lambda i: (0, 0)),  # v (resident)
            pl.BlockSpec((tq, sk), lambda i: (i, 0)),  # dropout scale tile
        ],
        out_specs=pl.BlockSpec((tq, dv), lambda i: (i, 0)),
        compiler_params=pltpu.CompilerParams(
            dimension_semantics=("parallel",),
        ),
        cost_estimate=pl.CostEstimate(
            flops=flops,
            transcendentals=sq * sk,
            bytes_accessed=bytes_accessed,
        ),
    )(q, k, v, drop_scale)


def init_unused_linear_params(key):
    """Deterministic init of the module's (unused) Linear layers, for fidelity only."""
    def linear(key, fan_in, fan_out):
        kw, kb = jax.random.split(key)
        bound = 1.0 / math.sqrt(fan_in)
        w = jax.random.uniform(kw, (fan_out, fan_in), jnp.float32, -bound, bound)
        b = jax.random.uniform(kb, (fan_out,), jnp.float32, -bound, bound)
        return w, b

    kq, kk, kv = jax.random.split(key, 3)
    return {
        "q_lin": linear(kq, 2, 5),
        "k_lin": linear(kk, 3, 6),
        "v_lin": linear(kv, 3, 8),
    }


if __name__ == "__main__":
    key = jax.random.PRNGKey(0)
    k_params, k_q, k_k, k_v, k_drop = jax.random.split(key, 5)

    # Unused parameters (forward never touches self.q / self.k / self.v).
    _params = init_unused_linear_params(k_params)

    # Small, lane-dense, self-consistent attention shapes.
    SQ, SK, D, DV = 256, 128, 128, 128
    q = jax.random.normal(k_q, (SQ, D), dtype=jnp.float32)
    k = jax.random.normal(k_k, (SK, D), dtype=jnp.float32)
    v = jax.random.normal(k_v, (SK, DV), dtype=jnp.float32)

    # Inverted-dropout mask (training semantics): keep w.p. 1-p, scale by 1/(1-p).
    # TODO(synk): mask is generated host-side with jax.random (pltpu.prng_* has
    # no non-Mosaic lowering); it will not match PyTorch's PRNG bit-for-bit.
    keep = jax.random.bernoulli(k_drop, p=1.0 - DROPOUT_P, shape=(SQ, SK))
    drop_scale = keep.astype(jnp.float32) * (1.0 / (1.0 - DROPOUT_P))

    out = attention_with_dropout(q, k, v, drop_scale)
    jax.block_until_ready(out)

    assert out.shape == (SQ, DV) and out.dtype == jnp.float32
    assert bool(jnp.all(jnp.isfinite(out)))
    print("KERNEL_OK")
</pallas_src>

<mosaic_0001>
module attributes {stable_mosaic.version = 11 : i64} {
  func.func @_attn_dropout_kernel(%arg0: i32, %arg1: memref<128x128xf32, #tpu.memory_space<vmem>>, %arg2: memref<128x128xf32, #tpu.memory_space<vmem>>, %arg3: memref<128x128xf32, #tpu.memory_space<vmem>>, %arg4: memref<128x128xf32, #tpu.memory_space<vmem>>, %arg5: memref<128x128xf32, #tpu.memory_space<vmem>>) attributes {dimension_semantics = [#tpu.dimension_semantics<parallel>], iteration_bounds = array<i64: 2>, scalar_prefetch = 0 : i64, scratch_operands = 0 : i64, tpu.core_type = #tpu.core_type<tc>, window_params = [{transform_indices = @transform_0, window_bounds = array<i64: 128, 128>}, {pipeline_mode = #tpu.pipeline_mode<synchronous>, transform_indices = @transform_1, window_bounds = array<i64: 128, 128>}, {pipeline_mode = #tpu.pipeline_mode<synchronous>, transform_indices = @transform_2, window_bounds = array<i64: 128, 128>}, {transform_indices = @transform_3, window_bounds = array<i64: 128, 128>}, {transform_indices = @transform_4, window_bounds = array<i64: 128, 128>}]} {
    %c0 = arith.constant 0 : index
    %c0_0 = arith.constant 0 : index
    %0 = vector.load %arg1[%c0, %c0_0] : memref<128x128xf32, #tpu.memory_space<vmem>>, vector<128x128xf32>
    %c0_1 = arith.constant 0 : index
    %c0_2 = arith.constant 0 : index
    %1 = vector.load %arg2[%c0_1, %c0_2] : memref<128x128xf32, #tpu.memory_space<vmem>>, vector<128x128xf32>
    %c0_3 = arith.constant 0 : index
    %c0_4 = arith.constant 0 : index
    %2 = vector.load %arg3[%c0_3, %c0_4] : memref<128x128xf32, #tpu.memory_space<vmem>>, vector<128x128xf32>
    %cst = arith.constant dense<0.000000e+00> : vector<128x128xf32>
    %3 = tpu.matmul %0, %1, %cst {dimension_numbers = #tpu.dot_dimension_numbers<[1], [1], [0], [0], [0, 0, 1, 0], [], []>} : vector<128x128xf32>, vector<128x128xf32>, vector<128x128xf32> -> vector<128x128xf32>
    %cst_5 = arith.constant 0.0883883461 : f32
    %4 = vector.broadcast %cst_5 : f32 to vector<128x128xf32>
    %5 = arith.mulf %3, %4 : vector<128x128xf32>
    %cst_6 = arith.constant dense<0xFF800000> : vector<128xf32>
    %6 = vector.multi_reduction <maximumf>, %5, %cst_6 [1] : vector<128x128xf32> to vector<128xf32>
    %7 = vector.shape_cast %6 : vector<128xf32> to vector<128x1xf32>
    %8 = vector.broadcast %7 : vector<128x1xf32> to vector<128x128xf32>
    %9 = arith.subf %5, %8 : vector<128x128xf32>
    %10 = math.exp %9 : vector<128x128xf32>
    %cst_7 = arith.constant dense<0.000000e+00> : vector<128xf32>
    %11 = vector.multi_reduction <add>, %10, %cst_7 [1] : vector<128x128xf32> to vector<128xf32>
    %12 = vector.shape_cast %11 : vector<128xf32> to vector<128x1xf32>
    %cst_8 = arith.constant 1.000000e+00 : f32
    %13 = vector.broadcast %cst_8 : f32 to vector<128x1xf32>
    %14 = arith.divf %13, %12 : vector<128x1xf32>
    %c0_9 = arith.constant 0 : index
    %c0_10 = arith.constant 0 : index
    %15 = vector.load %arg4[%c0_9, %c0_10] : memref<128x128xf32, #tpu.memory_space<vmem>>, vector<128x128xf32>
    %16 = vector.broadcast %14 : vector<128x1xf32> to vector<128x128xf32>
    %17 = arith.mulf %15, %16 : vector<128x128xf32>
    %18 = arith.mulf %10, %17 : vector<128x128xf32>
    %cst_11 = arith.constant dense<0.000000e+00> : vector<128x128xf32>
    %19 = tpu.matmul %18, %2, %cst_11 {dimension_numbers = #tpu.dot_dimension_numbers<[1], [0], [0], [1], [0, 0, 1, 1], [], []>} : vector<128x128xf32>, vector<128x128xf32>, vector<128x128xf32> -> vector<128x128xf32>
    %c0_12 = arith.constant 0 : index
    %c0_13 = arith.constant 0 : index
    %20 = vector.load %arg5[%c0_12, %c0_13] : memref<128x128xf32, #tpu.memory_space<vmem>>, vector<128x128xf32>
    tpu.vector_store %arg5[%c0_12, %c0_13], %19 {strides = array<i32>} : memref<128x128xf32, #tpu.memory_space<vmem>>, vector<128x128xf32>,
    return
  }
  func.func @transform_0(%arg0: i32) -> (i32, i32) {
    %c0_i32 = arith.constant 0 : i32
    %c0_i32_0 = arith.constant 0 : i32
    return %arg0, %c0_i32 : i32, i32
  }
  func.func @transform_1(%arg0: i32) -> (i32, i32) {
    %c0_i32 = arith.constant 0 : i32
    %c0_i32_0 = arith.constant 0 : i32
    %c0_i32_1 = arith.constant 0 : i32
    return %c0_i32, %c0_i32_0 : i32, i32
  }
  func.func @transform_2(%arg0: i32) -> (i32, i32) {
    %c0_i32 = arith.constant 0 : i32
    %c0_i32_0 = arith.constant 0 : i32
    %c0_i32_1 = arith.constant 0 : i32
    return %c0_i32, %c0_i32_0 : i32, i32
  }
  func.func @transform_3(%arg0: i32) -> (i32, i32) {
    %c0_i32 = arith.constant 0 : i32
    %c0_i32_0 = arith.constant 0 : i32
    return %arg0, %c0_i32 : i32, i32
  }
  func.func @transform_4(%arg0: i32) -> (i32, i32) {
    %c0_i32 = arith.constant 0 : i32
    %c0_i32_0 = arith.constant 0 : i32
    return %arg0, %c0_i32 : i32, i32
  }
}

</mosaic_0001>

<bundles_post_ra>
// kernel: tpu_custom_call.1
= control target key start
LH: loop header
LB: loop body
LE: loop exit
PB: predicated region body
PF: predicated region fallthrough
CT: control target
= control target key end

     0   :  { %s2003_s0 = inlined_call_operand.hbm [shape: f32[256,128], index: 0, kind: input, shape index: {}]   ;;  %s2004_s1 = inlined_call_operand.hbm [shape: f32[128,128], index: 1, kind: input, shape index: {}]   ;;  %s2005_s2 = inlined_call_operand.hbm [shape: f32[128,128], index: 2, kind: input, shape index: {}]   ;;  %s2006_s3 = inlined_call_operand.hbm [shape: f32[256,128], index: 3, kind: input, shape index: {}]   ;;  %s2007_s4 = inlined_call_operand.hbm [shape: f32[256,128], index: 4, kind: output, shape index: {}]  }
   0x1   :  { %2013 = sst [smem:[#allocation15_spill]] %s2003_s0 }
   0x2   :  { %2014 = sst [smem:[#allocation16_spill]] %s2004_s1 }
   0x3   :  { %2015 = sst [smem:[#allocation17_spill]] %s2005_s2 }
   0x4   :  { %9 = vsyncpa [#allocation3], 0 }
   0x5   :  { %11 = vsyncpa [#allocation3 + $0x1], 0 }
   0x6   :  { %12 = vsyncpa [#allocation6], 0 }
   0x7   :  { %13 = vsyncpa [#allocation9], 0 }
   0x8   :  { %15 = vsyncpa [#allocation9 + $0x1], 0 }
   0x9   :  { %16 = vsyncpa [#allocation4], 0 }
   0xa   :  { %18 = vsyncpa [#allocation4 + $0x1], 0  ;;  %s1493_s15 = smov 0   ;;  %s1495_s16 = smov 0  }
   0xb   :  { %s1497_s17 = smov 0   ;;  %s1499_s18 = smov 0  }
   0xc LB: > { %s1514_s19 = sadd.s32 4294967295, %s1460_s18   ;;  %s1037_s20 = sadd.s32 4294967294, %s1460_s18   ;;  %s1460_s18 = sphi %s1499_s18, %s2041_s18   ;;  %s1456_s17 = sphi %s1497_s17, %s2040_s17   ;;  %s1452_s16 = sphi %s1495_s16, %s2039_s16   ;;  %s1448_s15 = sphi %s1493_s15, %s2038_s15  }
   0xd   : > { %p44_p0 = scmp.ne.s32.totalorder %s1452_s16, %s1448_s15  ;;  %p45_p1 = scmp.eq.s32.totalorder %s1514_s19, 0 }
   0xe   : > { %p136_p2 = scmp.eq.s32.totalorder %s1514_s19, 1  ;;  %p142_p3 = scmp.eq.s32.totalorder %s1037_s20, 1 }
   0xf   : > { %p1523_p4 = por %p45_p1, %p44_p0  ;;  %p1038_p5 = scmp.ge.s32.totalorder %s1460_s18, 1 }
  0x10   : > { %p1528_p6 = por %p142_p3, %p44_p0  ;;  %p149_p7 = scmp.lt.s32.totalorder %s1460_s18, 3 }
  0x11   : > { %s2018_s1 = sld [smem:[#allocation16_spill]]  ;;  %s1462_s27 = smov [#allocation5]  }
  0x12   : > { %p1536_p8 = pnand %p1038_p5, %p149_p7  ;;  %s162_s28 = sshll.u32 %s1462_s27, 4  ;;  %s163_s28 = int_to_ptr.vmem [resolvable:$true] %s162_s28 }
  0x13   : > { %s2020_s2 = sld [smem:[#allocation17_spill]]  ;;  %s2008_s6 = smov 128  }
  0x14   : > { %p1140_p9 = pneg %p1536_p8  ;;  %s2010_s7 = smov 8  }
  0x15   : > { %s1465_s8 = smov [#allocation7]   ;;  %s1555_s10 = sadd.s32 1, %s1460_s18  }
  0x16   : > { %p1141_p10 = pnand %p1140_p9, %p45_p1  ;;  %s176_s9 = sshll.u32 %s1465_s8, 4  ;;  %s177_s9 = int_to_ptr.vmem [resolvable:$true] %s176_s9 }
  0x17   : > { %s160_s25 = sshll.u32 %s2018_s1, 4  ;;  %s31_s11 = sadd.s32 1, %s1456_s17  ;;  %s161_s25 = int_to_ptr.hbm [resolvable:$true] %s160_s25 }
  0x18   : > { %1143 = dma.hbm_to_vmem [thread:$0]  (!%p1141_p10), %s161_s25, 2048, %s163_s28, [#allocation6], %s2008_s6, %s2008_s6, %s2010_s7  }
  0x19   : > { %s174_s5 = sshll.u32 %s2020_s2, 4  ;;  %s28_s12 = ssub.s32 %s1460_s18, %s1555_s10  ;;  %s175_s5 = int_to_ptr.hbm [resolvable:$true] %s174_s5 }
  0x1a   : > { %1146 = dma.hbm_to_vmem [thread:$0]  (!%p1141_p10), %s175_s5, 2048, %s177_s9, [#allocation6], %s2008_s6, %s2008_s6, %s2010_s7  }
  0x1b   : > { %p38_p12 = scmp.ne.s32.totalorder %s1456_s17, %s1452_s16  ;;  %p29_p13 = scmp.eq.s32.totalorder %s28_s12, 0 }
  0x1c   : > { %p39_p0 = scmp.eq.s32.totalorder %s1460_s18, 0  ;;  %p1160_p5 = scmp.lt.s32.totalorder %s1460_s18, 2 }
  0x1d   : > { %p1565_p3 = por %p136_p2, %p38_p12  ;;  %s1574_s20 = sand.u32 1, %s1456_s17  }
  0x1e   : > { %s1571_s14 = scalar_select %p29_p13, %s1456_s17, %s31_s11  }
  0x1f   : > { %p40_p7 = por %p39_p0, %p38_p12  ;;  %s2012_s23 = sshll.u32 %s1574_s20, 7 }
  0x20   : > { %s1059_s24 = sshll.u32 %s1460_s18, 7  ;;  %s2022_s0 = sld [smem:[#allocation15_spill]] }
  0x21   : > { %s194_s29 = scalar_lea.vmem [#allocation2], %s2012_s23  ;;  %p1583_p2 = pnand %p1160_p5, %p40_p7 }
  0x22   : > { %s202_s30 = sshll.u32 %s194_s29, 4  ;;  %s221_s12 = scalar_lea.hbm %s2006_s3, %s1059_s24  ;;  %s203_s30 = int_to_ptr.vmem [resolvable:$true] %s202_s30 }
  0x23   : > { %s191_s6 = scalar_lea.sflag [#allocation3], %s1574_s20  ;;  %p1330_p10 = pneg %p1583_p2 }
  0x26   : > { %s199_s28 = scalar_lea.hbm %s2022_s0, %s1059_s24  ;;  %s1333_s29 = scalar_lea.hbm %s2022_s0, 256 }
  0x27   : > { %s200_s5 = sshll.u32 %s199_s28, 4  ;;  %s201_s5 = int_to_ptr.hbm [resolvable:$true] %s200_s5 }
  0x28   : > { %s1326_s7 = sshra.s32 %s201_s5, 4  ;;  %s1327_s7 = int_to_ptr.hbm [resolvable:$true] %s1326_s7 }
  0x29   : > { %s1328_s25 = scalar_lea.hbm %s1327_s7, 128  ;;  %p1334_p0 = scmp.lt.s32.totalorder %s1327_s7, %s2022_s0 }
  0x2a   : > { %p1329_p9 = scmp.ne.s32.totalorder %s1327_s7, %s1328_s25  ;;  %p1335_p5 = scmp.lt.s32.totalorder %s1333_s29, %s1328_s25 }
  0x2c   : > { %p1331_p12 = pnand %p1330_p10, %p1329_p9  ;;  %p1336_p7 = por %p1335_p5, %p1334_p0 }
  0x2e   : > { %p1332_p13 = pneg %p1331_p12 }
  0x30   : > { %p1337_p11 = pnand %p1336_p7, %p1332_p13 }
  0x32   : > { %1340 = shalt.err (!%p1337_p11)
}
  0x33   : > { %s2024_s24 = smov 8   ;;  %s2025_s11 = smov 128  }
  0x34   : > { %1150 = dma.hbm_to_vmem [thread:$0]  (!%p1583_p2), %s201_s5, 2048, %s203_s30, %s191_s6, %s2025_s11, %s2025_s11, %s2024_s24  }
  0x35   : > { %s222_s1 = sshll.u32 %s221_s12, 4  ;;  %s2026_s27 = sshll.u32 %s1574_s20, 7  ;;  %s223_s1 = int_to_ptr.hbm [resolvable:$true] %s222_s1 }
  0x36   : > { %s216_s28 = scalar_lea.vmem [#allocation8], %s2026_s27  ;;  %s213_s7 = scalar_lea.sflag [#allocation9], %s1574_s20 }
  0x37   : > { %s224_s2 = sshll.u32 %s216_s28, 4  ;;  %s1356_s23 = sshra.s32 %s223_s1, 4  ;;  %s225_s2 = int_to_ptr.vmem [resolvable:$true] %s224_s2  ;;  %s1357_s23 = int_to_ptr.hbm [resolvable:$true] %s1356_s23 }
  0x38   : > { %s1358_s25 = scalar_lea.hbm %s1357_s23, 128  ;;  %s1363_s0 = scalar_lea.hbm %s2006_s3, 256 }
  0x39   : > { %p1359_p11 = scmp.ne.s32.totalorder %s1357_s23, %s1358_s25  ;;  %p1364_p13 = scmp.lt.s32.totalorder %s1357_s23, %s2006_s3 }
  0x3a   : > { %p1365_p0 = scmp.lt.s32.totalorder %s1363_s0, %s1358_s25 }
  0x3b   : > { %p1361_p9 = pnand %p1359_p11, %p1330_p10 }
  0x3c   : > { %p1366_p5 = por %p1365_p0, %p1364_p13 }
  0x3d   : > { %p1362_p12 = pneg %p1361_p9 }
  0x3f   : > { %p1367_p7 = pnand %p1366_p5, %p1362_p12 }
  0x41   : > { %1370 = shalt.err (!%p1367_p7)
}
  0x42   : > { %1153 = dma.hbm_to_vmem [thread:$0]  (!%p1583_p2), %s223_s1, 2048, %s225_s2, %s213_s7, %s2025_s11, %s2025_s11, %s2024_s24  }
  0x43   : > { %236 = sbr.rel (%p1536_p8) target bundleno = 839 (0x347), region = 36  ;;  %s1627_s20 = sand.u32 (!%p1536_p8), 1, %s1452_s16  }
  0x44   : > { %s1630_s5 = sshll.u32 (!%p1536_p8), %s1627_s20, 7  ;;  %s239_s0 = scalar_lea.sflag (!%p1536_p8), [#allocation3], %s1627_s20 }
  0x45   : > { %s1634_s12 = scalar_lea.vmem (!%p1536_p8), [#allocation2], %s1630_s5 }
  0x48   : > { %1431 = dma.done.wait (%p1523_p4), %s239_s0, 2048  }
  0x49   : > { %1433 = vsyncadd (%p1523_p4), %s239_s0, 4294965248 }
  0x4a   : > { %1435 = dma.done.wait (%p45_p1), [#allocation6], 4096  }
  0x4b   : > { %1437 = vsyncadd (%p45_p1), [#allocation6], 4294963200  ;;  %s259_s1 = scalar_lea.sflag [#allocation9], %s1627_s20  ;;  %s1646_s2 = scalar_lea.vmem [#allocation8], %s1630_s5 }
  0x4c   : > { %1439 = dma.done.wait (%p1523_p4), %s259_s1, 2048  }
  0x4d   : > { %1441 = vsyncadd (%p1523_p4), %s259_s1, 4294965248  ;;  %v327_v0 = vld [vmem:[#allocation5 + $0x78] sm:$0xff]  ;;  %v326_v1 = vld [vmem:[#allocation5 + $0x70] sm:$0xff]  ;;  %s1947_s21 = scalar_lea.vmem [#allocation10], %s1630_s5  ;;  %s1061_s26 = sshll.u32 %s1514_s19, 7 }
  0x4e   : > { %344 = vmatpush.xpose.msra.mxu0 %v327_v0  ;;  %1062 = vmatpush.xpose.msra.mxu2 %v327_v0  ;;  %v325_v2 = vld [vmem:[#allocation5 + $0x68] sm:$0xff]  ;;  %v324_v3 = vld [vmem:[#allocation5 + $0x60] sm:$0xff]  ;;  %v323_v4 = vld [vmem:[#allocation5 + $0x58] sm:$0xff]  ;;  %s918_s11 = scalar_lea.hbm %s2007_s4, %s1061_s26  ;;  %s919_s27 = sshll.u32 %s1947_s21, 4  ;;  %s920_s27 = int_to_ptr.vmem [resolvable:$true] %s919_s27 }
  0x4f   : > { %1063 = vmatpush.xpose.msra.mxu3 %v327_v0  ;;  %v322_v5 = vld [vmem:[#allocation5 + $0x50] sm:$0xff]  ;;  %v321_v6 = vld [vmem:[#allocation5 + $0x48] sm:$0xff]  ;;  %v320_v7 = vld [vmem:[#allocation5 + $0x40] sm:$0xff]  ;;  %s921_s28 = sshll.u32 %s918_s11, 4  ;;  %s907_s7 = scalar_lea.sflag [#allocation4], %s1627_s20  ;;  %s922_s28 = int_to_ptr.hbm [resolvable:$true] %s921_s28 }
  0x50   : > { %v319_v8 = vld [vmem:[#allocation5 + $0x38] sm:$0xff]  ;;  %v318_v9 = vld [vmem:[#allocation5 + $0x30] sm:$0xff]  ;;  %v317_v10 = vld [vmem:[#allocation5 + $0x28] sm:$0xff]  ;;  %s1400_s23 = sshra.s32 %s922_s28, 4  ;;  %s1406_s9 = scalar_lea.hbm %s2007_s4, 256  ;;  %s1401_s23 = int_to_ptr.hbm [resolvable:$true] %s1400_s23 }
  0x51   : > { %v316_v11 = vld [vmem:[#allocation5 + $0x20] sm:$0xff]  ;;  %v315_v12 = vld [vmem:[#allocation5 + $0x18] sm:$0xff]  ;;  %v314_v13 = vld [vmem:[#allocation5 + $0x10] sm:$0xff]  ;;  %s1402_s25 = scalar_lea.hbm %s1401_s23, 128  ;;  %p1407_p2 = scmp.lt.s32.totalorder %s1401_s23, %s2007_s4 }
  0x52   : > { %345 = vmatpush.xpose.msra.mxu0 %v326_v1  ;;  %1064 = vmatpush.xpose.msra.mxu2 %v326_v1  ;;  %v313_v14 = vld [vmem:[#allocation5 + $0x8] sm:$0xff]  ;;  %v312_v15 = vld [vmem:[#allocation5] sm:$0xff]  ;;  %v302_v20 = vld [vmem:[%s1634_s12 + $0x30] sm:$0xff]  ;;  %p1403_p1 = scmp.ne.s32.totalorder %s1401_s23, %s1402_s25  ;;  %p1408_p10 = scmp.lt.s32.totalorder %s1406_s9, %s1402_s25 }
  0x53   : > { %1065 = vmatpush.xpose.msra.mxu3 %v326_v1  ;;  %v296_v16 = vld [vmem:[%s1634_s12] sm:$0xff]  ;;  %v301_v17 = vld [vmem:[%s1634_s12 + $0x28] sm:$0xff]  ;;  %v298_v22 = vld [vmem:[%s1634_s12 + $0x10] sm:$0xff] }
  0x54   : > { %v308_v18 = vld [vmem:[%s1634_s12 + $0x60] sm:$0xff]  ;;  %v297_v19 = vld [vmem:[%s1634_s12 + $0x8] sm:$0xff]  ;;  %v303_v23 = vld [vmem:[%s1634_s12 + $0x38] sm:$0xff]  ;;  %p1404_p4 = pnand %p1403_p1, %p1565_p3  ;;  %p1409_p11 = por %p1408_p10, %p1407_p2 }
  0x55   : > { %v309_v21 = vld [vmem:[%s1634_s12 + $0x68] sm:$0xff]  ;;  %v310_v24 = vld [vmem:[%s1634_s12 + $0x70] sm:$0xff]  ;;  %v299_v25 = vld [vmem:[%s1634_s12 + $0x18] sm:$0xff] }
  0x56   : > { %346 = vmatpush.xpose.msra.mxu0 %v325_v2  ;;  %1066 = vmatpush.xpose.msra.mxu2 %v325_v2  ;;  %v304_v26 = vld [vmem:[%s1634_s12 + $0x40] sm:$0xff]  ;;  %v305_v28 = vld [vmem:[%s1634_s12 + $0x48] sm:$0xff]  ;;  %v306_v29 = vld [vmem:[%s1634_s12 + $0x50] sm:$0xff]  ;;  %p1405_p8 = pneg %p1404_p4 }
  0x57   : > { %1067 = vmatpush.xpose.msra.mxu3 %v325_v2  ;;  %v300_v27 = vld [vmem:[%s1634_s12 + $0x20] sm:$0xff]  ;;  %v307_v30 = vld [vmem:[%s1634_s12 + $0x58] sm:$0xff] }
  0x58   : > { %v311_v32 = vld [vmem:[%s1634_s12 + $0x78] sm:$0xff]  ;;  %p1410_p9 = pnand %p1409_p11, %p1405_p8 }
  0x5a   : > { %347 = vmatpush.xpose.msra.mxu0 %v324_v3  ;;  %1068 = vmatpush.xpose.msra.mxu2 %v324_v3 }
  0x5b   : > { %1069 = vmatpush.xpose.msra.mxu3 %v324_v3 }
  0x5e   : > { %348 = vmatpush.xpose.msra.mxu0 %v323_v4  ;;  %1070 = vmatpush.xpose.msra.mxu2 %v323_v4 }
  0x5f   : > { %1071 = vmatpush.xpose.msra.mxu3 %v323_v4 }
  0x62   : > { %349 = vmatpush.xpose.msra.mxu0 %v322_v5  ;;  %1072 = vmatpush.xpose.msra.mxu2 %v322_v5 }
  0x63   : > { %1073 = vmatpush.xpose.msra.mxu3 %v322_v5 }
  0x66   : > { %350 = vmatpush.xpose.msra.mxu0 %v321_v6  ;;  %1074 = vmatpush.xpose.msra.mxu2 %v321_v6 }
  0x67   : > { %1075 = vmatpush.xpose.msra.mxu3 %v321_v6 }
  0x6a   : > { %351 = vmatpush.xpose.msra.mxu0 %v320_v7  ;;  %1076 = vmatpush.xpose.msra.mxu2 %v320_v7 }
  0x6b   : > { %1077 = vmatpush.xpose.msra.mxu3 %v320_v7 }
  0x6e   : > { %352 = vmatpush.xpose.msra.mxu0 %v319_v8  ;;  %1078 = vmatpush.xpose.msra.mxu2 %v319_v8 }
  0x6f   : > { %1079 = vmatpush.xpose.msra.mxu3 %v319_v8 }
  0x72   : > { %353 = vmatpush.xpose.msra.mxu0 %v318_v9  ;;  %1080 = vmatpush.xpose.msra.mxu2 %v318_v9 }
  0x73   : > { %1081 = vmatpush.xpose.msra.mxu3 %v318_v9 }
  0x76   : > { %354 = vmatpush.xpose.msra.mxu0 %v317_v10  ;;  %1082 = vmatpush.xpose.msra.mxu2 %v317_v10 }
  0x77   : > { %1083 = vmatpush.xpose.msra.mxu3 %v317_v10 }
  0x7a   : > { %355 = vmatpush.xpose.msra.mxu0 %v316_v11  ;;  %1084 = vmatpush.xpose.msra.mxu2 %v316_v11 }
  0x7b   : > { %1085 = vmatpush.xpose.msra.mxu3 %v316_v11 }
  0x7e   : > { %356 = vmatpush.xpose.msra.mxu0 %v315_v12  ;;  %1086 = vmatpush.xpose.msra.mxu2 %v315_v12 }
  0x7f   : > { %1087 = vmatpush.xpose.msra.mxu3 %v315_v12 }
  0x82   : > { %357 = vmatpush.xpose.msra.mxu0 %v314_v13  ;;  %1088 = vmatpush.xpose.msra.mxu2 %v314_v13 }
  0x83   : > { %1089 = vmatpush.xpose.msra.mxu3 %v314_v13 }
  0x86   : > { %358 = vmatpush.xpose.msra.mxu0 %v313_v14  ;;  %1090 = vmatpush.xpose.msra.mxu2 %v313_v14 }
  0x87   : > { %1091 = vmatpush.xpose.msra.mxu3 %v313_v14 }
  0x8a   : > { %359 = vmatpush.xpose.msra.mxu0 %v312_v15  ;;  %1092 = vmatpush.xpose.msra.mxu2 %v312_v15 }
  0x8b   : > { %1093 = vmatpush.xpose.msra.mxu3 %v312_v15 }
  0x8d   : > { %360 = vmatmul.f32.vlgmr.msra.gmra.mxu0 %v296_v16  ;;  %375 = vmatmul.f32.vlgmr.msra.gmra.mxu2 %v301_v17 }
  0x8e   : > { %396 = vmatmul.f32.vlgmr.msra.gmra.mxu3 %v308_v18 }
  0x95   : > { %363 = vmatmul.f32.gmra.mxu0 %v297_v19  ;;  %378 = vmatmul.f32.gmra.mxu2 %v302_v20 }
  0x96   : > { %399 = vmatmul.f32.gmra.mxu3 %v309_v21 }
  0x9d   : > { %366 = vmatmul.f32.gmra.mxu0 %v298_v22  ;;  %381 = vmatmul.f32.gmra.mxu2 %v303_v23 }
  0x9e   : > { %402 = vmatmul.f32.gmra.mxu3 %v310_v24 }
  0xa5   : > { %369 = vmatmul.f32.gmra.mxu0 %v299_v25  ;;  %384 = vmatmul.f32.gmra.mxu2 %v304_v26 }
  0xa6   : > { %405 = vmatmul.f32.gmra.mxu3 %v311_v32  ;;  %v342_v32 = vld [vmem:[#allocation7 + $0x70] sm:$0xff] }
  0xad   : > { %372 = vmatmul.f32.gmra.mxu0 %v300_v27  ;;  %387 = vmatmul.f32.gmra.mxu2 %v305_v28 }
  0xb5   : > { %390 = vmatmul.f32.gmra.mxu2 %v306_v29 }
  0xbd   : > { %393 = vmatmul.f32.gmra.mxu2 %v307_v30 }
 0x10a   : > { %v361_v31 = vpop.f32.mrf.mxu0 }
 0x10b   : > { %v1685_v58 = vmul.f32 0.088388346, %v361_v31  ;;  %v343_v31 = vld [vmem:[#allocation7 + $0x78] sm:$0xff] }
 0x10c   : > { %1094 = vmatpush.msra.mxu1 %v343_v31  ;;  %1095 = vmatpush.msrb.mxu3 %v343_v31 }
 0x10d   : > { %825 = vmatpush.msrb.mxu0 %v343_v31 }
 0x10e   : > { %1096 = vmatpush.msra.mxu1 %v342_v32  ;;  %1097 = vmatpush.msrb.mxu3 %v342_v32 }
 0x10f   : > { %826 = vmatpush.msrb.mxu0 %v342_v32 }
 0x110   : > { %v376_v33 = vpop.f32.mrf.mxu2 }
 0x111   : > { %v1671_v42 = vpop.f32.mrf.mxu3  ;;  %v414_v50 = vmul.f32 0.088388346, %v376_v33 }
 0x112   : > { %v364_v34 = vpop.f32.mrf.mxu0 }
 0x113   : > { %v1691_v60 = vmul.f32 0.088388346, %v364_v34 }
 0x118   : > { %v379_v35 = vpop.f32.mrf.mxu2 }
 0x119   : > { %v1668_v36 = vmul.f32 0.088388346, %v379_v35  ;;  %v400_v48 = vpop.f32.mrf.mxu3 }
 0x11a   : > { %v367_v37 = vpop.f32.mrf.mxu0  ;;  %v422_v52 = vmul.f32 0.088388346, %v400_v48 }
 0x11b   : > { %v411_v38 = vmul.f32 0.088388346, %v367_v37  ;;  %437 = vmax.xlane.f32.xlu2 %v1668_v36 }
 0x11d   : > { %429 = vmax.xlane.f32.xlu0 %v411_v38 }
 0x120   : > { %v382_v39 = vpop.f32.mrf.mxu2 }
 0x121   : > { %v416_v40 = vmul.f32 0.088388346, %v382_v39  ;;  %v403_v53 = vpop.f32.mrf.mxu3 }
 0x122   : > { %v370_v41 = vpop.f32.mrf.mxu0  ;;  %v1681_v56 = vmul.f32 0.088388346, %v403_v53 }
 0x123   : > { %v412_v43 = vmul.f32 0.088388346, %v370_v41  ;;  %439 = vmax.xlane.f32.xlu2 %v416_v40 }
 0x125   : > { %431 = vmax.xlane.f32.xlu0 %v412_v43 }
 0x128   : > { %v385_v44 = vpop.f32.mrf.mxu2 }
 0x129   : > { %v1673_v45 = vmul.f32 0.088388346, %v385_v44  ;;  %v406_v24 = vpop.f32.mrf.mxu3  ;;  %v339_v44 = vld [vmem:[#allocation7 + $0x58] sm:$0xff] }
 0x12a   : > { %v373_v46 = vpop.f32.mrf.mxu0  ;;  %v1707_v26 = vmul.f32 0.088388346, %v406_v24 }
 0x12b   : > { %v413_v47 = vmul.f32 0.088388346, %v373_v46 }
 0x12d   : > { %441 = vmax.xlane.f32.xlu0 %v1673_v45  ;;  %433 = vmax.xlane.f32.xlu1 %v413_v47 }
 0x130   : > { %v388_v49 = vpop.f32.mrf.mxu2 }
 0x131   : > { %v1676_v51 = vmul.f32 0.088388346, %v388_v49 }
 0x133   : > { %443 = vmax.xlane.f32.xlu2 %v1676_v51 }
 0x135   : > { %451 = vmax.xlane.f32.xlu0 %v422_v52  ;;  %435 = vmax.xlane.f32.xlu1 %v414_v50 }
 0x138   : > { %v391_v54 = vpop.f32.mrf.mxu2 }
 0x139   : > { %v1679_v55 = vmul.f32 0.088388346, %v391_v54 }
 0x13b   : > { %445 = vmax.xlane.f32.xlu2 %v1679_v55 }
 0x13d   : > { %453 = vmax.xlane.f32.xlu0 %v1681_v56 }
 0x140   : > { %v394_v57 = vpop.f32.mrf.mxu2 }
 0x141   : > { %v1687_v59 = vmul.f32 0.088388346, %v394_v57 }
 0x143   : > { %425 = vmax.xlane.f32.xlu2 %v1685_v58 }
 0x145   : > { %447 = vmax.xlane.f32.xlu0 %v1687_v59 }
 0x14d   : > { %427 = vmax.xlane.f32.xlu0 %v1691_v60 }
 0x18e   : > { %v438_v61 = vpop.xlane.xlu2 %437 }
 0x18f   : > { %v463_v22 = vsub.f32 %v1668_v36, %v438_v61  ;;  %v341_v36 = vld [vmem:[#allocation7 + $0x68] sm:$0xff] }
 0x190   : > { %v430_v62 = vpop.xlane.xlu0 %429  ;;  %1098 = vmatpush.msra.mxu1 %v341_v36  ;;  %1099 = vmatpush.msrb.mxu3 %v341_v36 }
 0x191   : > { %v459_v63 = vsub.f32 %v411_v38, %v430_v62  ;;  %v485_v27 = vmul.f32 1.442695, %v463_v22  ;;  %827 = vmatpush.msrb.mxu0 %v341_v36  ;;  %v338_v62 = vld [vmem:[#allocation7 + $0x50] sm:$0xff] }
 0x193   : > { %v477_v0 = vmul.f32 1.442695, %v459_v63  ;;  %v336_v63 = vld [vmem:[#allocation7 + $0x40] sm:$0xff] }
 0x195   : > { %1202 = vpow2.f32 %v477_v0  ;;  %v335_v0 = vld [vmem:[#allocation7 + $0x38] sm:$0xff] }
 0x196   : > { %v440_v1 = vpop.xlane.xlu2 %439 }
 0x197   : > { %v464_v2 = vsub.f32 %v416_v40, %v440_v1  ;;  %v340_v40 = vld [vmem:[#allocation7 + $0x60] sm:$0xff]  ;;  %v334_v1 = vld [vmem:[#allocation7 + $0x30] sm:$0xff] }
 0x198   : > { %v432_v3 = vpop.xlane.xlu0 %431  ;;  %1100 = vmatpush.msra.mxu1 %v340_v40  ;;  %1101 = vmatpush.msrb.mxu3 %v340_v40 }
 0x199   : > { %v487_v4 = vmul.f32 1.442695, %v464_v2  ;;  %v460_v5 = vsub.f32 %v412_v43, %v432_v3  ;;  %v1720_v43 = vmul.f32 0.088388346, %v1671_v42  ;;  %828 = vmatpush.msrb.mxu0 %v340_v40  ;;  %v333_v2 = vld [vmem:[#allocation7 + $0x28] sm:$0xff]  ;;  %v332_v3 = vld [vmem:[#allocation7 + $0x20] sm:$0xff] }
 0x19a   : > { %1102 = vmatpush.msra.mxu1 %v339_v44  ;;  %1103 = vmatpush.msrb.mxu3 %v339_v44 }
 0x19b   : > { %v1694_v6 = vpop.eup %1202  ;;  %1204 = vpow2.f32 %v487_v4  ;;  %v479_v7 = vmul.f32 1.442695, %v460_v5  ;;  %829 = vmatpush.msrb.mxu0 %v339_v44  ;;  %v331_v4 = vld [vmem:[#allocation7 + $0x18] sm:$0xff]  ;;  %v330_v5 = vld [vmem:[#allocation7 + $0x10] sm:$0xff] }
 0x19c   : > { %509 = vadd.xlane.f32.xlu1 %v1694_v6  ;;  %1104 = vmatpush.msra.mxu1 %v338_v62 }
 0x19d   : > { %1206 = vpow2.f32 %v479_v7  ;;  %1105 = vmatpush.msrb.mxu3 %v338_v62  ;;  %830 = vmatpush.msrb.mxu0 %v338_v62  ;;  %v329_v7 = vld [vmem:[#allocation7 + $0x8] sm:$0xff] }
 0x1a0   : > { %v442_v8 = vpop.xlane.xlu0 %441  ;;  %v434_v9 = vpop.xlane.xlu1 %433 }
 0x1a1   : > { %v1697_v10 = vpop.eup %1204  ;;  %v461_v11 = vsub.f32 %v413_v47, %v434_v9  ;;  %v465_v30 = vsub.f32 %v1673_v45, %v442_v8  ;;  %v328_v8 = vld [vmem:[#allocation7] sm:$0xff] }
 0x1a2   : > { %519 = vadd.xlane.f32.xlu0 %v1697_v10 }
 0x1a3   : > { %v1700_v12 = vpop.eup %1206  ;;  %v481_v13 = vmul.f32 1.442695, %v461_v11  ;;  %v489_v38 = vmul.f32 1.442695, %v465_v30 }
 0x1a4   : > { %511 = vadd.xlane.f32.xlu1 %v1700_v12 }
 0x1a5   : > { %1208 = vpow2.f32 %v481_v13 }
 0x1a6   : > { %v444_v14 = vpop.xlane.xlu2 %443 }
 0x1a7   : > { %v466_v33 = vsub.f32 %v1676_v51, %v444_v14 }
 0x1a8   : > { %v452_v15 = vpop.xlane.xlu0 %451  ;;  %v436_v16 = vpop.xlane.xlu1 %435 }
 0x1a9   : > { %v470_v17 = vsub.f32 %v422_v52, %v452_v15  ;;  %v462_v18 = vsub.f32 %v414_v50, %v436_v16  ;;  %v491_v41 = vmul.f32 1.442695, %v466_v33 }
 0x1ab   : > { %v499_v19 = vmul.f32 1.442695, %v470_v17  ;;  %v483_v20 = vmul.f32 1.442695, %v462_v18  ;;  %v1703_v21 = vpop.eup %1208 }
 0x1ac   : > { %513 = vadd.xlane.f32.xlu1 %v1703_v21 }
 0x1ad   : > { %1210 = vpow2.f32 %v499_v19 }
 0x1ae   : > { %1212 = vpow2.f32 %v483_v20  ;;  %v446_v23 = vpop.xlane.xlu2 %445 }
 0x1af   : > { %1214 = vpow2.f32 %v485_v27  ;;  %v467_v46 = vsub.f32 %v1679_v55, %v446_v23  ;;  %v779_v27 = vld [vmem:[%s1646_s2 + $0x10] sm:$0xff] }
 0x1b0   : > { %v454_v25 = vpop.xlane.xlu0 %453 }
 0x1b1   : > { %v471_v47 = vsub.f32 %v1681_v56, %v454_v25  ;;  %v493_v42 = vmul.f32 1.442695, %v467_v46 }
 0x1b3   : > { %v1709_v28 = vpop.eup %1210  ;;  %v501_v51 = vmul.f32 1.442695, %v471_v47 }
 0x1b4   : > { %v1711_v29 = vpop.eup %1212  ;;  %531 = vadd.xlane.f32.xlu0 %v1709_v28  ;;  %455 = vmax.xlane.f32.xlu1 %v1707_v26 }
 0x1b5   : > { %515 = vadd.xlane.f32.xlu2 %v1711_v29  ;;  %v1722_v45 = vpop.eup %1214 }
 0x1b6   : > { %v426_v34 = vpop.xlane.xlu2 %425 }
 0x1b7   : > { %v457_v35 = vsub.f32 %v1685_v58, %v426_v34 }
 0x1b8   : > { %v448_v37 = vpop.xlane.xlu0 %447 }
 0x1b9   : > { %v473_v39 = vmul.f32 1.442695, %v457_v35  ;;  %v468_v55 = vsub.f32 %v1687_v59, %v448_v37  ;;  %v337_v59 = vld [vmem:[#allocation7 + $0x48] sm:$0xff] }
 0x1ba   : > { %1106 = vmatpush.msra.mxu1 %v337_v59  ;;  %1107 = vmatpush.msrb.mxu3 %v337_v59 }
 0x1bb   : > { %1216 = vpow2.f32 %v473_v39  ;;  %v495_v57 = vmul.f32 1.442695, %v468_v55  ;;  %831 = vmatpush.msrb.mxu0 %v337_v59 }
 0x1bc   : > { %1218 = vpow2.f32 %v489_v38  ;;  %449 = vmax.xlane.f32.xlu1 %v1720_v43  ;;  %1108 = vmatpush.msra.mxu1 %v336_v63 }
 0x1bd   : > { %517 = vadd.xlane.f32.xlu2 %v1722_v45  ;;  %1220 = vpow2.f32 %v491_v41  ;;  %1109 = vmatpush.msrb.mxu3 %v336_v63 }
 0x1be   : > { %1222 = vpow2.f32 %v493_v42  ;;  %832 = vmatpush.msrb.mxu0 %v336_v63  ;;  %1110 = vmatpush.msra.mxu1 %v335_v0 }
 0x1bf   : > { %1111 = vmatpush.msrb.mxu3 %v335_v0 }
 0x1c0   : > { %v428_v48 = vpop.xlane.xlu0 %427  ;;  %833 = vmatpush.msrb.mxu0 %v335_v0  ;;  %1112 = vmatpush.msra.mxu1 %v334_v1 }
 0x1c1   : > { %v1728_v49 = vpop.eup %1216  ;;  %v458_v50 = vsub.f32 %v1691_v60, %v428_v48  ;;  %1113 = vmatpush.msrb.mxu3 %v334_v1 }
 0x1c2   : > { %505 = vadd.xlane.f32.xlu0 %v1728_v49  ;;  %v1732_v52 = vpop.eup %1218  ;;  %834 = vmatpush.msrb.mxu0 %v334_v1 }
 0x1c3   : > { %v475_v53 = vmul.f32 1.442695, %v458_v50  ;;  %v1734_v54 = vpop.eup %1220  ;;  %1114 = vmatpush.msra.mxu1 %v333_v2  ;;  %1115 = vmatpush.msrb.mxu3 %v333_v2  ;;  %v780_v50 = vld [vmem:[%s1646_s2 + $0x18] sm:$0xff] }
 0x1c4   : > { %521 = vadd.xlane.f32.xlu1 %v1732_v52  ;;  %v1739_v56 = vpop.eup %1222  ;;  %835 = vmatpush.msrb.mxu0 %v333_v2 }
 0x1c5   : > { %1224 = vpow2.f32 %v475_v53  ;;  %523 = vadd.xlane.f32.xlu2 %v1734_v54  ;;  %1116 = vmatpush.msra.mxu1 %v332_v3 }
 0x1c6   : > { %1226 = vpow2.f32 %v501_v51  ;;  %1117 = vmatpush.msrb.mxu3 %v332_v3  ;;  %836 = vmatpush.msrb.mxu0 %v332_v3 }
 0x1c7   : > { %1228 = vpow2.f32 %v495_v57  ;;  %1118 = vmatpush.msra.mxu1 %v331_v4 }
 0x1c8   : > { %1119 = vmatpush.msrb.mxu3 %v331_v4  ;;  %837 = vmatpush.msrb.mxu0 %v331_v4 }
 0x1c9   : > { %1120 = vmatpush.msra.mxu1 %v330_v5 }
 0x1ca   : > { %1121 = vmatpush.msrb.mxu3 %v330_v5  ;;  %838 = vmatpush.msrb.mxu0 %v330_v5 }
 0x1cb   : > { %v1741_v58 = vpop.eup %1224  ;;  %1122 = vmatpush.msra.mxu1 %v329_v7 }
 0x1cc   : > { %v1743_v60 = vpop.eup %1226  ;;  %507 = vadd.xlane.f32.xlu0 %v1741_v58  ;;  %525 = vadd.xlane.f32.xlu1 %v1739_v56 }
 0x1cd   : > { %533 = vadd.xlane.f32.xlu2 %v1743_v60  ;;  %v1748_v61 = vpop.eup %1228  ;;  %1123 = vmatpush.msrb.mxu3 %v329_v7 }
 0x1ce   : > { %839 = vmatpush.msrb.mxu0 %v329_v7  ;;  %1124 = vmatpush.msra.mxu1 %v328_v8 }
 0x1cf   : > { %1125 = vmatpush.msrb.mxu3 %v328_v8 }
 0x1d0   : > { %840 = vmatpush.msrb.mxu0 %v328_v8 }
 0x1d4   : > { %527 = vadd.xlane.f32.xlu1 %v1748_v61 }
 0x20f   : > { %v510_v9 = vpop.xlane.xlu1 %509 }
 0x210   : > { %1230 = vrcp.f32 %v510_v9  ;;  %v578_v16 = vand.u32 2147483648, %v510_v9  ;;  %v576_v18 = vand.u32 2147483647, %v510_v9  ;;  %vm572_vm1 = vweird.f32 %v510_v9 }
 0x212   : > { %v579_v22 = vor.u32 1.1754944e-38, %v578_v16  ;;  %vm577_vm3 = vcmp.eq.f32.partialorder %v576_v18, 8.507059e+37 }
 0x215   : > { %v1751_v23 = vpop.xlane.xlu0 %519 }
 0x216   : > { %v1231_v11 = vpop.eup %1230 }
 0x217   : > { %v568_v13 = vmul.f32 %v1231_v11, %v510_v9  ;;  %v512_v14 = vpop.xlane.xlu1 %511  ;;  %vm573_vm0 = vweird.f32 %v1231_v11 }
 0x218   : > { %1232 = vrcp.f32 %v512_v14  ;;  %vm574_vm2 = vmor %vm572_vm1, %vm573_vm0  ;;  %v593_v35 = vand.u32 2147483648, %v512_v14  ;;  %vm587_vm5 = vweird.f32 %v512_v14  ;;  %v591_v38 = vand.u32 2147483647, %v512_v14 }
 0x219   : > { %v569_v15 = vsub.f32 1.0, %v568_v13 }
 0x21a   : > { %v594_v48 = vor.u32 1.1754944e-38, %v593_v35  ;;  %vm592_vm7 = vcmp.eq.f32.partialorder %v591_v38, 8.507059e+37 }
 0x21b   : > { %v570_v17 = vmul.f32 %v1231_v11, %v569_v15 }
 0x21d   : > { %v571_v19 = vadd.f32 %v1231_v11, %v570_v17 }
 0x21e   : > { %v1233_v20 = vpop.eup %1232 }
 0x21f   : > { %v583_v24 = vmul.f32 %v1233_v20, %v512_v14  ;;  %v575_v25 = vsel %vm574_vm2, %v1231_v11, %v571_v19  ;;  %v514_v30 = vpop.xlane.xlu1 %513  ;;  %vm588_vm4 = vweird.f32 %v1233_v20  ;;  %v781_v14 = vld [vmem:[%s1646_s2 + $0x20] sm:$0xff] }
 0x220   : > { %v580_v31 = vsel %vm577_vm3, %v579_v22, %v575_v25  ;;  %1234 = vrcp.f32 %v514_v30  ;;  %vm1756_vm6 = vmor %vm587_vm5, %vm588_vm4  ;;  %v608_v63 = vand.u32 2147483648, %v514_v30  ;;  %v606_v2 = vand.u32 2147483647, %v514_v30 }
 0x221   : > { %v584_v32 = vsub.f32 1.0, %v583_v24  ;;  %1236 = vrcp.f32 %v1751_v23  ;;  %v795_v33 = vmul.f32 %v779_v27, %v580_v31  ;;  %vm602_vm9 = vweird.f32 %v514_v30 }
 0x222   : > { %v609_v13 = vor.u32 1.1754944e-38, %v608_v63  ;;  %vm607_vm11 = vcmp.eq.f32.partialorder %v606_v2, 8.507059e+37  ;;  %vm647_vm3 = vweird.f32 %v1751_v23 }
 0x223   : > { %v585_v34 = vmul.f32 %v1233_v20, %v584_v32  ;;  %v811_v36 = vmul.f32 %v1694_v6, %v795_v33 }
 0x225   : > { %v586_v37 = vadd.f32 %v1233_v20, %v585_v34  ;;  %847 = vmatmul.f32.vlgmr.msra.gmra.mxu1 %v811_v36 }
 0x226   : > { %v1235_v40 = vpop.eup %1234 }
 0x227   : > { %v1760_v41 = vpop.xlane.xlu0 %531  ;;  %v590_v44 = vsel %vm1756_vm6, %v1233_v20, %v586_v37  ;;  %v1764_v46 = vpop.eup %1236  ;;  %v598_v47 = vmul.f32 %v1235_v40, %v514_v30  ;;  %vm603_vm8 = vweird.f32 %v1235_v40 }
 0x228   : > { %1238 = vrcp.f32 %v1760_v41  ;;  %v1767_v6 = vpop.xlane.xlu2 %515  ;;  %v456_v42 = vpop.xlane.xlu1 %455  ;;  %v595_v55 = vsel %vm592_vm7, %v594_v48, %v590_v44  ;;  %v643_v57 = vmul.f32 %v1764_v46, %v1751_v23  ;;  %vm604_vm10 = vmor %vm602_vm9, %vm603_vm8  ;;  %v743_v16 = vand.u32 2147483648, %v1760_v41 }
 0x229   : > { %1240 = vrcp.f32 %v1767_v6  ;;  %v599_v51 = vsub.f32 1.0, %v598_v47  ;;  %v472_v53 = vsub.f32 %v1707_v26, %v456_v42  ;;  %v796_v62 = vmul.f32 %v780_v50, %v595_v55  ;;  %v790_v42 = vld [vmem:[%s1646_s2 + $0x68] sm:$0xff] }
 0x22a   : > { %v644_v7 = vsub.f32 1.0, %v643_v57  ;;  %v741_v22 = vand.u32 2147483647, %v1760_v41  ;;  %vm648_vm13 = vweird.f32 %v1764_v46  ;;  %vm737_vm14 = vweird.f32 %v1760_v41 }
 0x22b   : > { %v600_v59 = vmul.f32 %v1235_v40, %v599_v51  ;;  %v503_v0 = vmul.f32 1.442695, %v472_v53  ;;  %v812_v1 = vmul.f32 %v1700_v12, %v796_v62  ;;  %v744_v36 = vor.u32 1.1754944e-38, %v743_v16  ;;  %vm1829_vm6 = vmor %vm647_vm3, %vm648_vm13 }
 0x22c   : > { %v645_v27 = vmul.f32 %v1764_v46, %v644_v7  ;;  %v621_v37 = vand.u32 2147483647, %v1767_v6  ;;  %vm742_vm1 = vcmp.eq.f32.partialorder %v741_v22, 8.507059e+37  ;;  %vm617_vm2 = vweird.f32 %v1767_v6 }
 0x22d   : > { %1242 = vpow2.f32 %v503_v0  ;;  %v601_v4 = vadd.f32 %v1235_v40, %v600_v59  ;;  %850 = vmatmul.f32.gmra.mxu1 %v812_v1  ;;  %v653_v50 = vand.u32 2147483648, %v1751_v23  ;;  %v651_v53 = vand.u32 2147483647, %v1751_v23 }
 0x22e   : > { %v1239_v3 = vpop.eup %1238  ;;  %v646_v48 = vadd.f32 %v1764_v46, %v645_v27  ;;  %vm622_vm5 = vcmp.eq.f32.partialorder %v621_v37, 8.507059e+37 }
 0x22f   : > { %v1775_v5 = vpop.eup %1240  ;;  %v733_v26 = vmul.f32 %v1239_v3, %v1760_v41  ;;  %v605_v12 = vsel %vm604_vm10, %v1235_v40, %v601_v4  ;;  %vm738_vm12 = vweird.f32 %v1239_v3  ;;  %vm652_vm7 = vcmp.eq.f32.partialorder %v651_v53, 8.507059e+37 }
 0x230   : > { %v613_v8 = vmul.f32 %v1775_v5, %v1767_v6  ;;  %v1780_v9 = vpop.xlane.xlu2 %517  ;;  %v450_v11 = vpop.xlane.xlu1 %449  ;;  %v610_v19 = vsel %vm607_vm11, %v609_v13, %v605_v12  ;;  %vm1798_vm15 = vmor %vm737_vm14, %vm738_vm12  ;;  %vm618_vm0 = vweird.f32 %v1775_v5  ;;  %v650_v23 = vsel %vm1829_vm6, %v1764_v46, %v646_v48 }
 0x231   : > { %v734_v15 = vsub.f32 1.0, %v733_v26  ;;  %1244 = vrcp.f32 %v1780_v9  ;;  %v469_v18 = vsub.f32 %v1720_v43, %v450_v11  ;;  %v797_v24 = vmul.f32 %v781_v14, %v610_v19  ;;  %vm619_vm4 = vmor %vm617_vm2, %vm618_vm0  ;;  %v784_v19 = vld [vmem:[%s1646_s2 + $0x38] sm:$0xff] }
 0x232   : > { %v614_v17 = vsub.f32 1.0, %v613_v8  ;;  %v623_v43 = vand.u32 2147483648, %v1767_v6  ;;  %v782_v6 = vld [vmem:[%s1646_s2 + $0x28] sm:$0xff]  ;;  %v638_v8 = vand.u32 2147483648, %v1780_v9  ;;  %v636_v11 = vand.u32 2147483647, %v1780_v9 }
 0x233   : > { %v735_v20 = vmul.f32 %v1239_v3, %v734_v15  ;;  %v1787_v25 = vpop.eup %1242  ;;  %v497_v31 = vmul.f32 1.442695, %v469_v18  ;;  %v813_v34 = vmul.f32 %v1703_v21, %v797_v24  ;;  %vm632_vm10 = vweird.f32 %v1780_v9 }
 0x234   : > { %v615_v30 = vmul.f32 %v1775_v5, %v614_v17  ;;  %535 = vadd.xlane.f32.xlu2 %v1787_v25  ;;  %v624_v51 = vor.u32 1.1754944e-38, %v623_v43 }
 0x235   : > { %v736_v32 = vadd.f32 %v1239_v3, %v735_v20  ;;  %v1795_v33 = vpop.xlane.xlu0 %505  ;;  %1246 = vpow2.f32 %v497_v31  ;;  %853 = vmatmul.f32.gmra.mxu1 %v813_v34  ;;  %v783_v31 = vld [vmem:[%s1646_s2 + $0x30] sm:$0xff] }
 0x236   : > { %1248 = vrcp.f32 %v1795_v33  ;;  %v616_v21 = vadd.f32 %v1775_v5, %v615_v30  ;;  %v548_v15 = vand.u32 2147483648, %v1795_v33  ;;  %vm542_vm11 = vweird.f32 %v1795_v33 }
 0x237   : > { %v1804_v38 = vpop.eup %1244  ;;  %v740_v39 = vsel %vm1798_vm15, %v1239_v3, %v736_v32  ;;  %v639_v30 = vor.u32 1.1754944e-38, %v638_v8  ;;  %vm637_vm15 = vcmp.eq.f32.partialorder %v636_v11, 8.507059e+37 }
 0x238   : > { %v628_v40 = vmul.f32 %v1804_v38, %v1780_v9  ;;  %v1813_v41 = vpop.xlane.xlu2 %523  ;;  %v1815_v44 = vpop.xlane.xlu1 %521  ;;  %v745_v47 = vsel %vm742_vm1, %v744_v36, %v740_v39  ;;  %v620_v57 = vsel %vm619_vm4, %v1775_v5, %v616_v21  ;;  %v654_v5 = vor.u32 1.1754944e-38, %v653_v50  ;;  %v777_v36 = vld [vmem:[%s1646_s2] sm:$0xff] }
 0x239   : > { %1250 = vrcp.f32 %v1815_v44  ;;  %v625_v62 = vsel %vm622_vm5, %v624_v51, %v620_v57  ;;  %v806_v59 = vmul.f32 %v790_v42, %v745_v47  ;;  %vm633_vm8 = vweird.f32 %v1804_v38 }
 0x23a   : > { %v629_v55 = vsub.f32 1.0, %v628_v40  ;;  %v798_v1 = vmul.f32 %v782_v6, %v625_v62  ;;  %1252 = vrcp.f32 %v1813_v41  ;;  %v655_v12 = vsel %vm652_vm7, %v654_v5, %v650_v23  ;;  %vm634_vm12 = vmor %vm632_vm10, %vm633_vm8 }
 0x23b   : > { %v1833_v0 = vpop.eup %1246  ;;  %v822_v4 = vmul.f32 %v1709_v28, %v806_v59  ;;  %v546_v28 = vand.u32 2147483647, %v1795_v33  ;;  %v800_v32 = vmul.f32 %v784_v19, %v655_v12  ;;  %v549_v34 = vor.u32 1.1754944e-38, %v548_v15  ;;  %v778_v12 = vld [vmem:[%s1646_s2 + $0x8] sm:$0xff] }
 0x23c   : > { %v1249_v2 = vpop.eup %1248  ;;  %v630_v3 = vmul.f32 %v1804_v38, %v629_v55  ;;  %529 = vadd.xlane.f32.xlu1 %v1833_v0  ;;  %v814_v7 = vmul.f32 %v1711_v29, %v798_v1  ;;  %vm662_vm0 = vweird.f32 %v1815_v44 }
 0x23d   : > { %v538_v26 = vmul.f32 %v1249_v2, %v1795_v33  ;;  %880 = vmatmul.f32.vlgmr.msrb.gmra.mxu3 %v822_v4  ;;  %vm543_vm9 = vweird.f32 %v1249_v2  ;;  %vm547_vm14 = vcmp.eq.f32.partialorder %v546_v28, 8.507059e+37 }
 0x23e   : > { %856 = vmatmul.f32.gmra.mxu1 %v814_v7  ;;  %v631_v18 = vadd.f32 %v1804_v38, %v630_v3  ;;  %vm1868_vm13 = vmor %vm542_vm11, %vm543_vm9 }
 0x23f   : > { %v1845_v46 = vpop.xlane.xlu0 %507  ;;  %v1848_v13 = vpop.eup %1250  ;;  %v539_v14 = vsub.f32 1.0, %v538_v26 }
 0x240   : > { %1254 = vrcp.f32 %v1845_v46  ;;  %v1853_v29 = vpop.xlane.xlu2 %533  ;;  %v658_v16 = vmul.f32 %v1848_v13, %v1815_v44  ;;  %v1858_v17 = vpop.xlane.xlu1 %525  ;;  %v635_v35 = vsel %vm634_vm12, %v1804_v38, %v631_v18  ;;  %v668_v38 = vand.u32 2147483648, %v1815_v44 }
 0x241   : > { %1256 = vrcp.f32 %v1853_v29  ;;  %v540_v20 = vmul.f32 %v1249_v2, %v539_v14  ;;  %v1863_v22 = vpop.eup %1252  ;;  %v640_v33 = vsel %vm637_vm15, %v639_v30, %v635_v35  ;;  %v561_v53 = vand.u32 2147483647, %v1845_v46 }
 0x242   : > { %v659_v24 = vsub.f32 1.0, %v658_v16  ;;  %v673_v9 = vmul.f32 %v1863_v22, %v1813_v41  ;;  %1258 = vrcp.f32 %v1858_v17  ;;  %v799_v42 = vmul.f32 %v783_v31, %v640_v33  ;;  %v785_v31 = vld [vmem:[%s1646_s2 + $0x40] sm:$0xff] }
 0x243   : > { %v541_v27 = vadd.f32 %v1249_v2, %v540_v20  ;;  %v563_v55 = vand.u32 2147483648, %v1845_v46  ;;  %vm663_vm1 = vweird.f32 %v1848_v13  ;;  %v758_v23 = vand.u32 2147483648, %v1853_v29 }
 0x244   : > { %v660_v40 = vmul.f32 %v1848_v13, %v659_v24  ;;  %v815_v57 = vmul.f32 %v1722_v45, %v799_v42  ;;  %v674_v62 = vsub.f32 1.0, %v673_v9  ;;  %v666_v45 = vand.u32 2147483647, %v1815_v44  ;;  %vm1903_vm7 = vmor %vm662_vm0, %vm663_vm1 }
 0x245   : > { %v545_v21 = vsel %vm1868_vm13, %v1249_v2, %v541_v27  ;;  %vm557_vm4 = vweird.f32 %v1845_v46  ;;  %vm562_vm5 = vcmp.eq.f32.partialorder %v561_v53, 8.507059e+37  ;;  %vm752_vm6 = vweird.f32 %v1853_v29 }
 0x246   : > { %v1255_v37 = vpop.eup %1254  ;;  %v550_v48 = vsel %vm547_vm14, %v549_v34, %v545_v21  ;;  %859 = vmatmul.f32.gmra.mxu1 %v815_v57  ;;  %v661_v3 = vadd.f32 %v1848_v13, %v660_v40  ;;  %v675_v8 = vmul.f32 %v1863_v22, %v674_v62  ;;  %v564_v11 = vor.u32 1.1754944e-38, %v563_v55  ;;  %v787_v55 = vld [vmem:[%s1646_s2 + $0x50] sm:$0xff] }
 0x247   : > { %v1257_v39 = vpop.eup %1256  ;;  %v553_v47 = vmul.f32 %v1255_v37, %v1845_v46  ;;  %v793_v51 = vmul.f32 %v777_v36, %v550_v48  ;;  %vm558_vm2 = vweird.f32 %v1255_v37  ;;  %v759_v15 = vor.u32 1.1754944e-38, %v758_v23 }
 0x248   : > { %v748_v50 = vmul.f32 %v1257_v39, %v1853_v29  ;;  %v1890_v2 = vpop.xlane.xlu1 %527  ;;  %v1893_v4 = vpop.eup %1258  ;;  %vm753_vm3 = vweird.f32 %v1257_v39  ;;  %vm559_vm8 = vmor %vm557_vm4, %vm558_vm2  ;;  %v665_v44 = vsel %vm1903_vm7, %v1848_v13, %v661_v3  ;;  %v669_v18 = vor.u32 1.1754944e-38, %v668_v38  ;;  %v788_v3 = vld [vmem:[%s1646_s2 + $0x58] sm:$0xff] }
 0x249   : > { %v554_v6 = vsub.f32 1.0, %v553_v47  ;;  %v809_v63 = vmul.f32 %v1728_v49, %v793_v51  ;;  %v756_v49 = vand.u32 2147483647, %v1853_v29  ;;  %1260 = vrcp.f32 %v1890_v2  ;;  %vm754_vm9 = vmor %vm752_vm6, %vm753_vm3  ;;  %v791_v29 = vld [vmem:[%s1646_s2 + $0x70] sm:$0xff] }
 0x24a   : > { %v749_v59 = vsub.f32 1.0, %v748_v50  ;;  %v688_v14 = vmul.f32 %v1893_v4, %v1858_v17  ;;  %v816_v20 = vmul.f32 %v1697_v10, %v800_v32  ;;  %vm667_vm11 = vcmp.eq.f32.partialorder %v666_v45, 8.507059e+37 }
 0x24b   : > { %v555_v1 = vmul.f32 %v1255_v37, %v554_v6  ;;  %841 = vmatmul.f32.vlgmr.msrb.gmra.mxu0 %v809_v63  ;;  %vm757_vm10 = vcmp.eq.f32.partialorder %v756_v49, 8.507059e+37  ;;  %v670_v30 = vsel %vm667_vm11, %v669_v18, %v665_v44  ;;  %v676_v35 = vadd.f32 %v1863_v22, %v675_v8 }
 0x24c   : > { %v750_v5 = vmul.f32 %v1257_v39, %v749_v59  ;;  %v689_v34 = vsub.f32 1.0, %v688_v14  ;;  %vm678_vm12 = vweird.f32 %v1863_v22  ;;  %vm677_vm13 = vweird.f32 %v1813_v41 }
 0x24d   : > { %v556_v26 = vadd.f32 %v1255_v37, %v555_v1  ;;  %v801_v32 = vmul.f32 %v785_v31, %v670_v30  ;;  %v681_v9 = vand.u32 2147483647, %v1813_v41  ;;  %vm679_vm14 = vmor %vm677_vm13, %vm678_vm12  ;;  %vm693_vm0 = vweird.f32 %v1893_v4 }
 0x24e   : > { %v751_v46 = vadd.f32 %v1257_v39, %v750_v5  ;;  %862 = vmatmul.f32.gmra.mxu1 %v816_v20  ;;  %v680_v21 = vsel %vm679_vm14, %v1863_v22, %v676_v35  ;;  %vm692_vm1 = vweird.f32 %v1858_v17  ;;  %v696_v22 = vand.u32 2147483647, %v1858_v17  ;;  %v789_v35 = vld [vmem:[%s1646_s2 + $0x60] sm:$0xff] }
 0x24f   : > { %v560_v28 = vsel %vm559_vm8, %v1255_v37, %v556_v26  ;;  %v1261_v36 = vpop.eup %1260  ;;  %v683_v37 = vand.u32 2147483648, %v1813_v41  ;;  %v817_v40 = vmul.f32 %v1732_v52, %v801_v32  ;;  %vm682_vm15 = vcmp.eq.f32.partialorder %v681_v9, 8.507059e+37  ;;  %vm694_vm2 = vmor %vm692_vm1, %vm693_vm0 }
 0x250   : > { %v565_v16 = vsel %vm562_vm5, %v564_v11, %v560_v28  ;;  %v755_v19 = vsel %vm754_vm9, %v1257_v39, %v751_v46  ;;  %v703_v33 = vmul.f32 %v1261_v36, %v1890_v2  ;;  %v698_v41 = vand.u32 2147483648, %v1858_v17 }
 0x251   : > { %v794_v24 = vmul.f32 %v778_v12, %v565_v16  ;;  %v760_v27 = vsel %vm757_vm10, %v759_v15, %v755_v19  ;;  %v684_v39 = vor.u32 1.1754944e-38, %v683_v37  ;;  %vm697_vm3 = vcmp.eq.f32.partialorder %v696_v22, 8.507059e+37  ;;  %v792_v15 = vld [vmem:[%s1646_s2 + $0x78] sm:$0xff] }
 0x252   : > { %v807_v43 = vmul.f32 %v791_v29, %v760_v27  ;;  %v704_v42 = vsub.f32 1.0, %v703_v33  ;;  %v699_v51 = vor.u32 1.1754944e-38, %v698_v41  ;;  %vm708_vm4 = vweird.f32 %v1261_v36 }
 0x253   : > { %v810_v13 = vmul.f32 %v1741_v58, %v794_v24  ;;  %v690_v58 = vmul.f32 %v1893_v4, %v689_v34  ;;  %v685_v47 = vsel %vm682_vm15, %v684_v39, %v680_v21  ;;  %v713_v62 = vand.u32 2147483648, %v1890_v2 }
 0x254   : > { %v823_v10 = vmul.f32 %v1743_v60, %v807_v43  ;;  %v786_v60 = vld [vmem:[%s1646_s2 + $0x48] sm:$0xff]  ;;  %v705_v50 = vmul.f32 %v1261_v36, %v704_v42  ;;  %vm707_vm5 = vweird.f32 %v1890_v2  ;;  %v711_v59 = vand.u32 2147483647, %v1890_v2 }
 0x255   : > { %844 = vmatmul.f32.gmra.mxu0 %v810_v13  ;;  %v691_v48 = vadd.f32 %v1893_v4, %v690_v58  ;;  %v802_v38 = vmul.f32 %v786_v60, %v685_v47  ;;  %vm709_vm6 = vmor %vm707_vm5, %vm708_vm4  ;;  %v714_v1 = vor.u32 1.1754944e-38, %v713_v62 }
 0x256   : > { %883 = vmatmul.f32.gmra.mxu3 %v823_v10  ;;  %865 = vmatmul.f32.gmra.mxu1 %v817_v40  ;;  %v706_v57 = vadd.f32 %v1261_v36, %v705_v50  ;;  %vm712_vm7 = vcmp.eq.f32.partialorder %v711_v59, 8.507059e+37 }
 0x257   : > { %v695_v52 = vsel %vm694_vm2, %v1893_v4, %v691_v48  ;;  %v818_v6 = vmul.f32 %v1734_v54, %v802_v38 }
 0x258   : > { %v700_v53 = vsel %vm697_vm3, %v699_v51, %v695_v52  ;;  %v710_v63 = vsel %vm709_vm6, %v1261_v36, %v706_v57 }
 0x259   : > { %v803_v17 = vmul.f32 %v787_v55, %v700_v53  ;;  %v715_v23 = vsel %vm712_vm7, %v714_v1, %v710_v63 }
 0x25a   : > { %v804_v4 = vmul.f32 %v788_v3, %v715_v23 }
 0x25b   : > { %v819_v54 = vmul.f32 %v1739_v56, %v803_v17 }
 0x25c   : > { %v820_v5 = vmul.f32 %v1748_v61, %v804_v4 }
 0x25e   : > { %868 = vmatmul.f32.gmra.mxu1 %v818_v6 }
 0x266   : > { %871 = vmatmul.f32.gmra.mxu1 %v819_v54 }
 0x26e   : > { %874 = vmatmul.f32.gmra.mxu1 %v820_v5 }
 0x2a2   : > { %v848_v45 = vpop.f32.mrf.mxu1 }
 0x2a3   : > { %892 = vst [vmem:[%s1947_s21 + $0x10] sm:$0xff] %v848_v45 }
 0x2a7   : > { %v536_v2 = vpop.xlane.xlu2 %535 }
 0x2a8   : > { %1262 = vrcp.f32 %v536_v2  ;;  %v773_v11 = vand.u32 2147483648, %v536_v2  ;;  %v771_v12 = vand.u32 2147483647, %v536_v2  ;;  %vm767_vm9 = vweird.f32 %v536_v2 }
 0x2aa   : > { %v851_v49 = vpop.f32.mrf.mxu1  ;;  %v774_v44 = vor.u32 1.1754944e-38, %v773_v11  ;;  %vm772_vm11 = vcmp.eq.f32.partialorder %v771_v12, 8.507059e+37 }
 0x2ab   : > { %893 = vst [vmem:[%s1947_s21 + $0x18] sm:$0xff] %v851_v49 }
 0x2ae   : > { %v1263_v56 = vpop.eup %1262 }
 0x2af   : > { %v763_v26 = vmul.f32 %v1263_v56, %v536_v2  ;;  %v530_v7 = vpop.xlane.xlu1 %529  ;;  %vm768_vm8 = vweird.f32 %v1263_v56 }
 0x2b0   : > { %1264 = vrcp.f32 %v530_v7  ;;  %vm769_vm10 = vmor %vm767_vm9, %vm768_vm8  ;;  %v728_v24 = vand.u32 2147483648, %v530_v7  ;;  %v726_v30 = vand.u32 2147483647, %v530_v7  ;;  %vm722_vm13 = vweird.f32 %v530_v7 }
 0x2b1   : > { %v764_v8 = vsub.f32 1.0, %v763_v26 }
 0x2b2   : > { %v854_v46 = vpop.f32.mrf.mxu1  ;;  %v729_v13 = vor.u32 1.1754944e-38, %v728_v24  ;;  %vm727_vm15 = vcmp.eq.f32.partialorder %v726_v30, 8.507059e+37 }
 0x2b3   : > { %v765_v61 = vmul.f32 %v1263_v56, %v764_v8  ;;  %894 = vst [vmem:[%s1947_s21 + $0x20] sm:$0xff] %v854_v46 }
 0x2b5   : > { %v766_v14 = vadd.f32 %v1263_v56, %v765_v61 }
 0x2b6   : > { %v1265_v28 = vpop.eup %1264 }
 0x2b7   : > { %v718_v29 = vmul.f32 %v1265_v28, %v530_v7  ;;  %v770_v16 = vsel %vm769_vm10, %v1263_v56, %v766_v14  ;;  %vm723_vm12 = vweird.f32 %v1265_v28 }
 0x2b8   : > { %v775_v18 = vsel %vm772_vm11, %v774_v44, %v770_v16  ;;  %vm724_vm14 = vmor %vm722_vm13, %vm723_vm12 }
 0x2b9   : > { %v719_v19 = vsub.f32 1.0, %v718_v29  ;;  %v808_v20 = vmul.f32 %v792_v15, %v775_v18 }
 0x2bb   : > { %v720_v27 = vmul.f32 %v1265_v28, %v719_v19  ;;  %v824_v31 = vmul.f32 %v1787_v25, %v808_v20  ;;  %v857_v43 = vpop.f32.mrf.mxu1 }
 0x2bc   : > { %895 = vst [vmem:[%s1947_s21 + $0x28] sm:$0xff] %v857_v43 }
 0x2bd   : > { %v721_v34 = vadd.f32 %v1265_v28, %v720_v27  ;;  %886 = vmatmul.f32.gmra.mxu3 %v824_v31 }
 0x2bf   : > { %v725_v36 = vsel %vm724_vm14, %v1265_v28, %v721_v34 }
 0x2c0   : > { %v730_v37 = vsel %vm727_vm15, %v729_v13, %v725_v36  ;;  %v881_v10 = vpop.f32.mrf.mxu3 }
 0x2c1   : > { %v805_v32 = vmul.f32 %v789_v35, %v730_v37  ;;  %903 = vst [vmem:[%s1947_s21 + $0x68] sm:$0xff] %v881_v10 }
 0x2c3   : > { %v821_v25 = vmul.f32 %v1833_v0, %v805_v32  ;;  %v860_v9 = vpop.f32.mrf.mxu1 }
 0x2c4   : > { %896 = vst [vmem:[%s1947_s21 + $0x30] sm:$0xff] %v860_v9 }
 0x2c5   : > { %877 = vmatmul.f32.gmra.mxu1 %v821_v25 }
 0x2c8   : > { %v842_v58 = vpop.f32.mrf.mxu0 }
 0x2c9   : > { %890 = vst [vmem:[%s1947_s21] sm:$0xff] %v842_v58 }
 0x2cb   : > { %v863_v33 = vpop.f32.mrf.mxu1 }
 0x2cc   : > { %897 = vst [vmem:[%s1947_s21 + $0x38] sm:$0xff] %v863_v33 }
 0x2d2   : > { %v845_v21 = vpop.f32.mrf.mxu0 }
 0x2d3   : > { %891 = vst [vmem:[%s1947_s21 + $0x8] sm:$0xff] %v845_v21  ;;  %v866_v39 = vpop.f32.mrf.mxu1 }
 0x2d4   : > { %898 = vst [vmem:[%s1947_s21 + $0x40] sm:$0xff] %v866_v39 }
 0x2d9   : > { %v884_v40 = vpop.f32.mrf.mxu3 }
 0x2da   : > { %904 = vst [vmem:[%s1947_s21 + $0x70] sm:$0xff] %v884_v40 }
 0x2db   : > { %v869_v0 = vpop.f32.mrf.mxu1 }
 0x2dc   : > { %899 = vst [vmem:[%s1947_s21 + $0x48] sm:$0xff] %v869_v0 }
 0x2e3   : > { %v872_v47 = vpop.f32.mrf.mxu1 }
 0x2e4   : > { %900 = vst [vmem:[%s1947_s21 + $0x50] sm:$0xff] %v872_v47 }
 0x2eb   : > { %v875_v60 = vpop.f32.mrf.mxu1 }
 0x2ec   : > { %901 = vst [vmem:[%s1947_s21 + $0x58] sm:$0xff] %v875_v60 }
 0x340   : > { %v887_v42 = vpop.f32.mrf.mxu3 }
 0x341   : > { %905 = vst [vmem:[%s1947_s21 + $0x78] sm:$0xff] %v887_v42 }
 0x342   : > { %v878_v48 = vpop.f32.mrf.mxu1 }
 0x343   : > { %902 = vst [vmem:[%s1947_s21 + $0x60] sm:$0xff] %v878_v48 }
 0x344   : > { %1413 = shalt.err (!%p1410_p9)
}
 0x345   : > { %s1466_s20 = smov 128   ;;  %s1467_s5 = smov 8  }
 0x346   : > { %1138 = dma.vmem_to_hbm [thread:$0]  (%p1565_p3), %s920_s27, 2048, %s922_s28, %s907_s7, %s1466_s20, %s1466_s20, %s1467_s5  }
 0x347 PF: > { %s936_s0 = sand.u32 1, %s1448_s15   ;;  %p2037_p12 = scmp.ge.s32.totalorder %s1460_s18, 2 }
 0x348   : > { %s937_s12 = scalar_lea.sflag [#allocation4], %s936_s0 }
 0x349   : > { %p1155_p13 = pnand %p2037_p12, %p1528_p6 }
 0x34b   : > { %p1156_p0 = pneg %p1155_p13 }
 0x34d   : > { %1443 = dma.done.wait (%p1156_p0), %s937_s12, 2048  }
 0x34e   : > { %1445 = vsyncadd (%p1156_p0), %s937_s12, 4294965248  ;;  %p21_p5 = scmp.ge.s32.totalorder %s1555_s10, 4   ;;  %s2038_s15 = smov %s1452_s16 }
 0x34f   : > { %s2039_s16 = smov %s1456_s17  ;;  %s2040_s17 = smov %s1571_s14 }
 0x350   : > { %s2041_s18 = smov %s1555_s10  ;;  %23 = sbr.rel (!%p21_p5) target bundleno = 12 (0xc), region = 102 }
 0x355   :  { %943 = vsyncpa [#allocation3], 1 }
 0x356   :  { %945 = vsyncpa [#allocation3 + $0x1], 1 }
 0x357   :  { %946 = vsyncpa [#allocation6], 1 }
 0x358   :  { %947 = vsyncpa [#allocation9], 1 }
 0x359   :  { %949 = vsyncpa [#allocation9 + $0x1], 1 }
 0x35a   :  { %950 = vsyncpa [#allocation4], 1 }
 0x35b   :  { %952 = vsyncpa [#allocation4 + $0x1], 1 }

</bundles_post_ra>
